<compile_context>
chip_gen: v6e
topology: v6e:2x2x1
jax: 0.10.0
libtpu: 0.0.40
codegen_flags: <defaults>
</compile_context>

<pallas_src>
import functools

import jax
import jax.numpy as jnp
from jax.experimental import pallas as pl
from jax.experimental.pallas import tpu as pltpu

EPS = 1e-5       # PyTorch BatchNorm2d default eps
LANE = 128       # TPU lane width

_VMEM_LIMIT_CACHE = None


def _round_up(n, m):
    return ((n + m - 1) // m) * m


def _row_tiling(r):
    """Row tile + padded row count for the row-tiled (R, C) kernels.

    Prefers large 512-row blocks and pads + masks the ragged tail instead of
    collapsing to a single whole-array block.
    """
    if r >= 512:
        return 512, _round_up(r, 512)
    rt = _round_up(r, 8)
    return rt, rt


def _cout_tile(c):
    """Cout tile: 256-wide when possible (full v6e/v7x MXU), else 128."""
    return 256 if c % 256 == 0 else 128


def _vmem_limit_bytes():
    global _VMEM_LIMIT_CACHE
    if _VMEM_LIMIT_CACHE is None:
        limit = 48 * 1024 * 1024            # safe on v7x (64 MiB physical / TC)
        try:
            kind = jax.devices()[0].device_kind.lower()
            if ("v5" in kind) or ("v6" in kind):
                limit = 96 * 1024 * 1024    # 128 MiB physical VMEM parts
        except Exception:
            pass
        _VMEM_LIMIT_CACHE = limit
    return _VMEM_LIMIT_CACHE


def _cparams(sem):
    return pltpu.CompilerParams(dimension_semantics=sem,
                                vmem_limit_bytes=_vmem_limit_bytes())


# ----------------------------- Pallas kernels ------------------------------ #

def _bn_stats_kernel(x_ref, sum_ref, sq_ref):
    """Row-tiled per-channel sum / sum-of-squares reduction (accumulator outs).

    Zero-padded tail rows contribute 0 to both sums; the wrapper divides by the
    true row count, so no mask is needed here.
    """
    @pl.when(pl.program_id(0) == 0)
    def _():
        sum_ref[...] = jnp.zeros_like(sum_ref)
        sq_ref[...] = jnp.zeros_like(sq_ref)

    x = x_ref[...]                                    # (TR, C) f32
    sum_ref[...] += jnp.sum(x, axis=0, keepdims=True)
    sq_ref[...] += jnp.sum(x * x, axis=0, keepdims=True)


def _conv1_kernel(valid_rows, mask_rows, x_ref, sc_ref, sh_ref, w_ref,
                  o_ref, s_ref, q_ref):
    """o = relu(x*scale+shift) @ w (1x1 conv) with fused sum/sumsq of o."""
    i = pl.program_id(0)

    @pl.when(i == 0)
    def _():
        s_ref[...] = jnp.zeros_like(s_ref)
        q_ref[...] = jnp.zeros_like(q_ref)

    a = jnp.maximum(x_ref[...] * sc_ref[...] + sh_ref[...], 0.0)
    y = jnp.dot(a.astype(jnp.bfloat16), w_ref[...],
                preferred_element_type=jnp.float32)
    o_ref[...] = y.astype(o_ref.dtype)

    if mask_rows:   # padded tail rows must not pollute the batch statistics
        rt = y.shape[0]
        row = i * rt + jax.lax.broadcasted_iota(jnp.int32, (rt, 1), 0)
        y = jnp.where(row < valid_rows, y, 0.0)
    s_ref[...] += jnp.sum(y, axis=0, keepdims=True)
    q_ref[...] += jnp.sum(y * y, axis=0, keepdims=True)


def _conv1x1_add_kernel(x_ref, sc_ref, sh_ref, w_ref, r_ref, o_ref):
    """1x1 conv with fused residual add (identity-shortcut path)."""
    a = jnp.maximum(x_ref[...].astype(jnp.float32) * sc_ref[...] + sh_ref[...],
                    0.0)
    o_ref[...] = (jnp.dot(a.astype(jnp.bfloat16), w_ref[...],
                          preferred_element_type=jnp.float32) + r_ref[...])


def _tap_accum(a_pad, w_ref, ho, wo, stride, acc):
    """Accumulate the 9 tap matmuls of a 3x3 conv into acc.

    a_pad : (Hp, Wp, Cin) f32 value, already zero-padded spatially (pad=1)
    w_ref : (3, 3, Cin, CoutTile) bf16 weight ref
    acc   : (ho*wo, CoutTile) f32
    """
    hp, wp, cin = a_pad.shape
    if stride == 1:
        def window(kh, kw):
            return a_pad[kh:kh + ho, kw:kw + wo, :]
    else:
        # Pre-split into stride x stride spatial phases once (4 strided slices
        # for stride=2) instead of 9 strided slices inside the tap loop.
        phases = [[a_pad[p::stride, q::stride, :] for q in range(stride)]
                  for p in range(stride)]

        def window(kh, kw):
            ph = phases[kh % stride][kw % stride]
            return ph[kh // stride:kh // stride + ho,
                      kw // stride:kw // stride + wo, :]

    for kh in range(3):
        for kw in range(3):
            win = window(kh, kw)
            acc = acc + jnp.dot(win.reshape(ho * wo, cin).astype(jnp.bfloat16),
                                w_ref[kh, kw],
                                preferred_element_type=jnp.float32)
    return acc


def _conv2_kernel(stride, x_ref, sc_ref, sh_ref, w_ref, o_ref, s_ref, q_ref,
                  pad_ref):
    """3x3 conv (pad=1, stride) of relu(bn(x)) with fused output sum/sumsq.

    Spatial zero padding is done in a VMEM scratch (no padded HBM copy of the
    input, no border mask).
    """
    b = pl.program_id(1)

    @pl.when(b == 0)
    def _():
        s_ref[...] = jnp.zeros_like(s_ref)
        q_ref[...] = jnp.zeros_like(q_ref)

    h, w, cin = x_ref.shape[1], x_ref.shape[2], x_ref.shape[3]
    ho, wo, ct = o_ref.shape[1], o_ref.shape[2], o_ref.shape[3]

    pad_ref[...] = jnp.zeros_like(pad_ref)
    pad_ref[1:1 + h, 1:1 + w, :] = jnp.maximum(
        x_ref[0].astype(jnp.float32) * sc_ref[...].reshape(1, 1, cin)
        + sh_ref[...].reshape(1, 1, cin), 0.0)

    acc = jnp.zeros((ho * wo, ct), jnp.float32)
    acc = _tap_accum(pad_ref[...], w_ref, ho, wo, stride, acc)

    o_ref[0] = acc.reshape(ho, wo, ct).astype(o_ref.dtype)
    s_ref[...] += jnp.sum(acc, axis=0, keepdims=True)
    q_ref[...] += jnp.sum(acc * acc, axis=0, keepdims=True)


def _conv3_shortcut_kernel(stride, o2_ref, x_ref, sc3_ref, sh3_ref, w3_ref,
                           scs_ref, shs_ref, ws_ref, o_ref, pad_ref):
    """Fused: out = relu(bn3(o2)) @ w3 + conv3x3(relu(bnS(x)), pad=1, stride)."""
    ho, wo, ct = o_ref.shape[1], o_ref.shape[2], o_ref.shape[3]
    cmid = o2_ref.shape[3]
    h, w, cin = x_ref.shape[1], x_ref.shape[2], x_ref.shape[3]

    a3 = jnp.maximum(o2_ref[0].astype(jnp.float32)
                     * sc3_ref[...].reshape(1, 1, cmid)
                     + sh3_ref[...].reshape(1, 1, cmid), 0.0)
    acc = jnp.dot(a3.reshape(ho * wo, cmid).astype(jnp.bfloat16), w3_ref[...],
                  preferred_element_type=jnp.float32)

    pad_ref[...] = jnp.zeros_like(pad_ref)
    pad_ref[1:1 + h, 1:1 + w, :] = jnp.maximum(
        x_ref[0] * scs_ref[...].reshape(1, 1, cin)
        + shs_ref[...].reshape(1, 1, cin), 0.0)
    acc = _tap_accum(pad_ref[...], ws_ref, ho, wo, stride, acc)

    o_ref[0] = acc.reshape(ho, wo, ct)


# ----------------------------- kernel wrappers ----------------------------- #

def bn_stats(x2d, row_tile):
    rp, c = x2d.shape
    return pl.pallas_call(
        _bn_stats_kernel,
        out_shape=(jax.ShapeDtypeStruct((1, c), jnp.float32),
                   jax.ShapeDtypeStruct((1, c), jnp.float32)),
        grid_spec=pltpu.PrefetchScalarGridSpec(
            num_scalar_prefetch=0, grid=(rp // row_tile,),
            in_specs=[pl.BlockSpec((row_tile, c), lambda i: (i, 0))],
            out_specs=(pl.BlockSpec((1, c), lambda i: (0, 0)),
                       pl.BlockSpec((1, c), lambda i: (0, 0)))),
        compiler_params=_cparams(("arbitrary",)),
    )(x2d)


def conv1_fused(x2d, scale, shift, w, row_tile, valid_rows):
    rp, cin = x2d.shape
    cout = w.shape[1]
    kern = functools.partial(_conv1_kernel, valid_rows, rp != valid_rows)
    return pl.pallas_call(
        kern,
        out_shape=(jax.ShapeDtypeStruct((rp, cout), jnp.bfloat16),
                   jax.ShapeDtypeStruct((1, cout), jnp.float32),
                   jax.ShapeDtypeStruct((1, cout), jnp.float32)),
        grid_spec=pltpu.PrefetchScalarGridSpec(
            num_scalar_prefetch=0, grid=(rp // row_tile,),
            in_specs=[pl.BlockSpec((row_tile, cin), lambda i: (i, 0)),
                      pl.BlockSpec((1, cin), lambda i: (0, 0)),
                      pl.BlockSpec((1, cin), lambda i: (0, 0)),
                      pl.BlockSpec((cin, cout), lambda i: (0, 0))],
            out_specs=(pl.BlockSpec((row_tile, cout), lambda i: (i, 0)),
                       pl.BlockSpec((1, cout), lambda i: (0, 0)),
                       pl.BlockSpec((1, cout), lambda i: (0, 0)))),
        compiler_params=_cparams(("arbitrary",)),   # stats accumulators
    )(x2d, scale, shift, w)


def conv1x1_add(x2d, scale, shift, w, res, row_tile):
    rp, cin = x2d.shape
    cout = w.shape[1]
    return pl.pallas_call(
        _conv1x1_add_kernel,
        out_shape=jax.ShapeDtypeStruct((rp, cout), jnp.float32),
        grid_spec=pltpu.PrefetchScalarGridSpec(
            num_scalar_prefetch=0, grid=(rp // row_tile,),
            in_specs=[pl.BlockSpec((row_tile, cin), lambda i: (i, 0)),
                      pl.BlockSpec((1, cin), lambda i: (0, 0)),
                      pl.BlockSpec((1, cin), lambda i: (0, 0)),
                      pl.BlockSpec((cin, cout), lambda i: (0, 0)),
                      pl.BlockSpec((row_tile, cout), lambda i: (i, 0))],
            out_specs=pl.BlockSpec((row_tile, cout), lambda i: (i, 0))),
        compiler_params=_cparams(("parallel",)),
    )(x2d, scale, shift, w, res)


def conv2_fused(x4d, scale, shift, w, ho, wo, stride, cout_tile):
    n, h, wsp, cin = x4d.shape
    cout = w.shape[-1]
    nj = cout // cout_tile
    return pl.pallas_call(
        functools.partial(_conv2_kernel, stride),
        out_shape=(jax.ShapeDtypeStruct((n, ho, wo, cout), jnp.bfloat16),
                   jax.ShapeDtypeStruct((1, cout), jnp.float32),
                   jax.ShapeDtypeStruct((1, cout), jnp.float32)),
        grid_spec=pltpu.PrefetchScalarGridSpec(
            num_scalar_prefetch=0, grid=(nj, n),
            in_specs=[pl.BlockSpec((1, h, wsp, cin), lambda j, b: (b, 0, 0, 0)),
                      pl.BlockSpec((1, cin), lambda j, b: (0, 0)),
                      pl.BlockSpec((1, cin), lambda j, b: (0, 0)),
                      pl.BlockSpec((3, 3, cin, cout_tile),
                                   lambda j, b: (0, 0, 0, j))],
            out_specs=(pl.BlockSpec((1, ho, wo, cout_tile),
                                    lambda j, b: (b, 0, 0, j)),
                       pl.BlockSpec((1, cout_tile), lambda j, b: (0, j)),
                       pl.BlockSpec((1, cout_tile), lambda j, b: (0, j))),
            scratch_shapes=[pltpu.VMEM((h + 2, wsp + 2, cin), jnp.float32)]),
        compiler_params=_cparams(("parallel", "arbitrary")),
    )(x4d, scale, shift, w)


def conv3_shortcut_add(o2, xc, sc3, sh3, w3, scs, shs, ws, stride, cout_tile):
    n, ho, wo, cmid = o2.shape
    _, h, wsp, cin = xc.shape
    cout = w3.shape[1]
    nj = cout // cout_tile
    return pl.pallas_call(
        functools.partial(_conv3_shortcut_kernel, stride),
        out_shape=jax.ShapeDtypeStruct((n, ho, wo, cout), jnp.float32),
        grid_spec=pltpu.PrefetchScalarGridSpec(
            num_scalar_prefetch=0, grid=(nj, n),
            in_specs=[pl.BlockSpec((1, ho, wo, cmid), lambda j, b: (b, 0, 0, 0)),
                      pl.BlockSpec((1, h, wsp, cin), lambda j, b: (b, 0, 0, 0)),
                      pl.BlockSpec((1, cmid), lambda j, b: (0, 0)),
                      pl.BlockSpec((1, cmid), lambda j, b: (0, 0)),
                      pl.BlockSpec((cmid, cout_tile), lambda j, b: (0, j)),
                      pl.BlockSpec((1, cin), lambda j, b: (0, 0)),
                      pl.BlockSpec((1, cin), lambda j, b: (0, 0)),
                      pl.BlockSpec((3, 3, cin, cout_tile),
                                   lambda j, b: (0, 0, 0, j))],
            out_specs=pl.BlockSpec((1, ho, wo, cout_tile),
                                   lambda j, b: (b, 0, 0, j)),
            scratch_shapes=[pltpu.VMEM((h + 2, wsp + 2, cin), jnp.float32)]),
        compiler_params=_cparams(("parallel", "parallel")),
    )(o2, xc, sc3, sh3, w3, scs, shs, ws)


# ------------------------------- glue (JAX) -------------------------------- #

def _scale_shift(s, q, gamma, beta, rows, cpad):
    """Fold batch stats + affine into per-channel scale/shift (padded to cpad)."""
    c = gamma.shape[0]
    mean = s[0, :c] / rows
    var = jnp.maximum(q[0, :c] / rows - mean * mean, 0.0)   # biased variance
    scale = gamma * jax.lax.rsqrt(var + EPS)
    shift = beta - mean * scale
    scale = jnp.pad(scale, (0, cpad - c)).reshape(1, cpad)  # padded chans stay 0
    shift = jnp.pad(shift, (0, cpad - c)).reshape(1, cpad)
    return scale, shift


def init_bottleneck_params(key, in_ch, out_ch, stride=1):
    """PyTorch-layout parameters (OIHW conv weights, per-channel BN affine)."""
    mid = out_ch // 4
    ks = jax.random.split(key, 4)
    p = {
        "w1": jax.random.normal(ks[0], (mid, in_ch, 1, 1), jnp.float32) * 0.1,
        "g1": jnp.ones((in_ch,), jnp.float32), "b1": jnp.zeros((in_ch,), jnp.float32),
        "w2": jax.random.normal(ks[1], (mid, mid, 3, 3), jnp.float32) * 0.1,
        "g2": jnp.ones((mid,), jnp.float32), "b2": jnp.zeros((mid,), jnp.float32),
        "w3": jax.random.normal(ks[2], (out_ch, mid, 1, 1), jnp.float32) * 0.1,
        "g3": jnp.ones((mid,), jnp.float32), "b3": jnp.zeros((mid,), jnp.float32),
    }
    if stride != 1 or in_ch != out_ch:
        p["ws"] = jax.random.normal(ks[3], (out_ch, in_ch, 3, 3), jnp.float32) * 0.1
        p["gs"] = jnp.ones((in_ch,), jnp.float32)
        p["bs"] = jnp.zeros((in_ch,), jnp.float32)
    return p


def prepare_params(p):
    """One-time weight prep: reshape, pad channels to 128 multiples, cast bf16."""
    in_ch, mid, out_ch = p["w1"].shape[1], p["w1"].shape[0], p["w3"].shape[0]
    cinp, midp, outp = (_round_up(c, LANE) for c in (in_ch, mid, out_ch))

    def w1x1(w, ci, co):            # (Cout, Cin, 1, 1) -> (CiP, CoP) bf16
        m = jnp.transpose(w[:, :, 0, 0], (1, 0))
        return jnp.pad(m, ((0, ci - m.shape[0]),
                           (0, co - m.shape[1]))).astype(jnp.bfloat16)

    def w3x3(w, ci, co):            # (Cout, Cin, 3, 3) -> (3, 3, CiP, CoP) bf16
        m = jnp.transpose(w, (2, 3, 1, 0))
        return jnp.pad(m, ((0, 0), (0, 0),
                           (0, ci - m.shape[2]),
                           (0, co - m.shape[3]))).astype(jnp.bfloat16)

    prep = {
        "in_ch": in_ch, "out_ch": out_ch,
        "cinp": cinp, "midp": midp, "outp": outp,
        "w1": w1x1(p["w1"], cinp, midp),
        "w2": w3x3(p["w2"], midp, midp),
        "w3": w1x1(p["w3"], midp, outp),
        "g1": p["g1"], "b1": p["b1"],
        "g2": p["g2"], "b2": p["b2"],
        "g3": p["g3"], "b3": p["b3"],
    }
    if "ws" in p:
        prep["ws"] = w3x3(p["ws"], cinp, outp)
        prep["gs"], prep["bs"] = p["gs"], p["bs"]
    return prep


def bottleneck_forward_nhwc(x_nhwc, prep, stride=1):
    """NHWC fast path (no layout transposes)."""
    x = x_nhwc.astype(jnp.float32)
    n, h, w, in_ch = x.shape
    cinp, midp, outp = prep["cinp"], prep["midp"], prep["outp"]
    out_ch = prep["out_ch"]

    # lane-dense channel padding of the input (padded channels stay zero)
    xc = jnp.pad(x, ((0, 0), (0, 0), (0, 0), (0, cinp - in_ch)))
    r = n * h * w
    rt, rp = _row_tiling(r)
    x2d = xc.reshape(r, cinp)
    if rp != r:
        x2d = jnp.pad(x2d, ((0, rp - r), (0, 0)))

    # batch statistics of x — shared by conv1's BN and the shortcut's BN
    sx, qx = bn_stats(x2d, rt)
    sc1, sh1 = _scale_shift(sx, qx, prep["g1"], prep["b1"], r, cinp)

    # conv1 (1x1): fused BN+ReLU prologue and fused o1 sum/sumsq reduction
    o1, s1, q1 = conv1_fused(x2d, sc1, sh1, prep["w1"], rt, r)      # o1: bf16
    sc2, sh2 = _scale_shift(s1, q1, prep["g2"], prep["b2"], r, midp)

    # conv2 (3x3, pad=1, stride): in-kernel zero padding, fused o2 sum/sumsq
    ho = (h - 1) // stride + 1
    wo = (w - 1) // stride + 1
    o1_img = (o1 if rp == r else o1[:r]).reshape(n, h, w, midp)
    o2, s2, q2 = conv2_fused(o1_img, sc2, sh2, prep["w2"], ho, wo, stride,
                             _cout_tile(midp))                      # o2: bf16
    r2 = n * ho * wo
    sc3, sh3 = _scale_shift(s2, q2, prep["g3"], prep["b3"], r2, midp)

    if "ws" in prep:
        # conv3 (1x1) + 3x3 shortcut conv + residual add in one fused kernel
        scs, shs = _scale_shift(sx, qx, prep["gs"], prep["bs"], r, cinp)
        y = conv3_shortcut_add(o2, xc, sc3, sh3, prep["w3"], scs, shs,
                               prep["ws"], stride, _cout_tile(outp))
    else:
        # identity shortcut (in_ch == out_ch, stride == 1 -> r2 == r, cinp == outp)
        rt2, rp2 = _row_tiling(r2)
        o2_2d = o2.reshape(r2, midp)
        if rp2 != r2:
            o2_2d = jnp.pad(o2_2d, ((0, rp2 - r2), (0, 0)))
        y2d = conv1x1_add(o2_2d, sc3, sh3, prep["w3"], x2d, rt2)
        y = (y2d if rp2 == r2 else y2d[:r2]).reshape(n, ho, wo, outp)

    return y[..., :out_ch]


def bottleneck_forward(x_nchw, prep, stride=1):
    """PyTorch-layout (NCHW) compatibility wrapper."""
    x = jnp.transpose(x_nchw, (0, 2, 3, 1))
    y = bottleneck_forward_nhwc(x, prep, stride=stride)
    return jnp.transpose(y, (0, 3, 1, 2))


# ------------------------------ pure-JAX reference ------------------------- #

def _ref_bn_relu(x_nhwc, g, b):
    mean = jnp.mean(x_nhwc, axis=(0, 1, 2), keepdims=True)
    var = jnp.mean((x_nhwc - mean) ** 2, axis=(0, 1, 2), keepdims=True)
    return jnp.maximum((x_nhwc - mean) * jax.lax.rsqrt(var + EPS) * g + b, 0.0)


def _ref_conv(a, w_oihw, stride, padding):
    # bf16 operands + f32 accumulation to mirror the MXU numerics of the kernel
    return jax.lax.conv_general_dilated(
        a.astype(jnp.bfloat16),
        jnp.transpose(w_oihw, (2, 3, 1, 0)).astype(jnp.bfloat16),
        window_strides=(stride, stride),
        padding=[(padding, padding), (padding, padding)],
        dimension_numbers=("NHWC", "HWIO", "NHWC"),
        preferred_element_type=jnp.float32)


def bottleneck_reference(x_nchw, params, stride=1):
    x = jnp.transpose(x_nchw, (0, 2, 3, 1)).astype(jnp.float32)
    o = _ref_conv(_ref_bn_relu(x, params["g1"], params["b1"]), params["w1"], 1, 0)
    o = _ref_conv(_ref_bn_relu(o, params["g2"], params["b2"]), params["w2"], stride, 1)
    o = _ref_conv(_ref_bn_relu(o, params["g3"], params["b3"]), params["w3"], 1, 0)
    if "ws" in params:
        res = _ref_conv(_ref_bn_relu(x, params["gs"], params["bs"]),
                        params["ws"], stride, 1)
    else:
        res = x
    return jnp.transpose(o + res, (0, 3, 1, 2))


# ---------------------------------- main ----------------------------------- #

if __name__ == "__main__":
    key = jax.random.PRNGKey(0)
    kx, kp = jax.random.split(key)

    N, in_ch, H, W = 2, 4, 16, 16
    out_ch, stride = 16, 1

    x = jax.random.normal(kx, (N, in_ch, H, W), jnp.float32)   # NCHW, like PyTorch
    params = init_bottleneck_params(kp, in_ch, out_ch, stride=stride)
    prep = prepare_params(params)                              # hoisted weight prep

    out = jax.block_until_ready(bottleneck_forward(x, prep, stride=stride))
    assert out.shape == (N, out_ch, H // stride, W // stride)

    ref = jax.block_until_ready(bottleneck_reference(x, params, stride=stride))
    max_err = jnp.max(jnp.abs(out - ref))
    # bf16 MXU operands in both paths + bf16-stored intermediates in the kernel
    # path -> small residual diffs from rounding / accumulation order.
    assert jnp.allclose(out, ref, rtol=2e-2, atol=2e-2), f"max abs err = {max_err}"

    print("KERNEL_OK")
</pallas_src>

<mosaic_0001>
module attributes {stable_mosaic.version = 11 : i64} {
  func.func @_bn_stats_kernel(%arg0: i32, %arg1: memref<512x128xf32, #tpu.memory_space<vmem>>, %arg2: memref<1x128xf32, #tpu.memory_space<vmem>>, %arg3: memref<1x128xf32, #tpu.memory_space<vmem>>) attributes {dimension_semantics = [#tpu.dimension_semantics<arbitrary>], iteration_bounds = array<i64: 1>, scalar_prefetch = 0 : i64, scratch_operands = 0 : i64, tpu.core_type = #tpu.core_type<tc>, window_params = [{transform_indices = @transform_0, window_bounds = array<i64: 512, 128>}, {pipeline_mode = #tpu.pipeline_mode<synchronous>, transform_indices = @transform_1, window_bounds = array<i64: 1, 128>}, {pipeline_mode = #tpu.pipeline_mode<synchronous>, transform_indices = @transform_2, window_bounds = array<i64: 1, 128>}]} {
    %c0_i32 = arith.constant 0 : i32
    %0 = arith.cmpi eq, %arg0, %c0_i32 : i32
    %1 = arith.extui %0 : i1 to i32
    %c0_i32_0 = arith.constant 0 : i32
    %2 = arith.cmpi ne, %1, %c0_i32_0 : i32
    scf.if %2 {
      %cst_11 = arith.constant 0.000000e+00 : f32
      %15 = vector.broadcast %cst_11 : f32 to vector<1x128xf32>
      %c0_12 = arith.constant 0 : index
      %c0_13 = arith.constant 0 : index
      %16 = vector.load %arg2[%c0_12, %c0_13] : memref<1x128xf32, #tpu.memory_space<vmem>>, vector<1x128xf32>
      tpu.vector_store %arg2[%c0_12, %c0_13], %15 {strides = array<i32>} : memref<1x128xf32, #tpu.memory_space<vmem>>, vector<1x128xf32>,
      %cst_14 = arith.constant 0.000000e+00 : f32
      %17 = vector.broadcast %cst_14 : f32 to vector<1x128xf32>
      %c0_15 = arith.constant 0 : index
      %c0_16 = arith.constant 0 : index
      %18 = vector.load %arg3[%c0_15, %c0_16] : memref<1x128xf32, #tpu.memory_space<vmem>>, vector<1x128xf32>
      tpu.vector_store %arg3[%c0_15, %c0_16], %17 {strides = array<i32>} : memref<1x128xf32, #tpu.memory_space<vmem>>, vector<1x128xf32>,
    } else {
    }
    %c0 = arith.constant 0 : index
    %c0_1 = arith.constant 0 : index
    %3 = vector.load %arg1[%c0, %c0_1] : memref<512x128xf32, #tpu.memory_space<vmem>>, vector<512x128xf32>
    %c0_2 = arith.constant 0 : index
    %c0_3 = arith.constant 0 : index
    %4 = vector.load %arg2[%c0_2, %c0_3] : memref<1x128xf32, #tpu.memory_space<vmem>>, vector<1x128xf32>
    %cst = arith.constant dense<0.000000e+00> : vector<128xf32>
    %5 = vector.multi_reduction <add>, %3, %cst [0] : vector<512x128xf32> to vector<128xf32>
    %6 = vector.shape_cast %5 : vector<128xf32> to vector<1x128xf32>
    %7 = arith.addf %4, %6 : vector<1x128xf32>
    %c0_4 = arith.constant 0 : index
    %c0_5 = arith.constant 0 : index
    %8 = vector.load %arg2[%c0_4, %c0_5] : memref<1x128xf32, #tpu.memory_space<vmem>>, vector<1x128xf32>
    tpu.vector_store %arg2[%c0_4, %c0_5], %7 {strides = array<i32>} : memref<1x128xf32, #tpu.memory_space<vmem>>, vector<1x128xf32>,
    %c0_6 = arith.constant 0 : index
    %c0_7 = arith.constant 0 : index
    %9 = vector.load %arg3[%c0_6, %c0_7] : memref<1x128xf32, #tpu.memory_space<vmem>>, vector<1x128xf32>
    %10 = arith.mulf %3, %3 : vector<512x128xf32>
    %cst_8 = arith.constant dense<0.000000e+00> : vector<128xf32>
    %11 = vector.multi_reduction <add>, %10, %cst_8 [0] : vector<512x128xf32> to vector<128xf32>
    %12 = vector.shape_cast %11 : vector<128xf32> to vector<1x128xf32>
    %13 = arith.addf %9, %12 : vector<1x128xf32>
    %c0_9 = arith.constant 0 : index
    %c0_10 = arith.constant 0 : index
    %14 = vector.load %arg3[%c0_9, %c0_10] : memref<1x128xf32, #tpu.memory_space<vmem>>, vector<1x128xf32>
    tpu.vector_store %arg3[%c0_9, %c0_10], %13 {strides = array<i32>} : memref<1x128xf32, #tpu.memory_space<vmem>>, vector<1x128xf32>,
    return
  }
  func.func @transform_0(%arg0: i32) -> (i32, i32) {
    %c0_i32 = arith.constant 0 : i32
    %c0_i32_0 = arith.constant 0 : i32
    return %arg0, %c0_i32 : i32, i32
  }
  func.func @transform_1(%arg0: i32) -> (i32, i32) {
    %c0_i32 = arith.constant 0 : i32
    %c0_i32_0 = arith.constant 0 : i32
    %c0_i32_1 = arith.constant 0 : i32
    return %c0_i32, %c0_i32_0 : i32, i32
  }
  func.func @transform_2(%arg0: i32) -> (i32, i32) {
    %c0_i32 = arith.constant 0 : i32
    %c0_i32_0 = arith.constant 0 : i32
    %c0_i32_1 = arith.constant 0 : i32
    return %c0_i32, %c0_i32_0 : i32, i32
  }
}

</mosaic_0001>

<bundles_post_ra>
// kernel: tpu_custom_call.1
= control target key start
LH: loop header
LB: loop body
LE: loop exit
PB: predicated region body
PF: predicated region fallthrough
CT: control target
= control target key end

     0   :  { %8 = vsyncpa [#allocation3], 0  ;;  %s435_s0 = inlined_call_operand.hbm [shape: f32[512,128], index: 0, kind: input, shape index: {}]   ;;  %s436_s1 = inlined_call_operand.hbm [shape: f32[1,128], index: 1, kind: output, shape index: {0}]   ;;  %s437_s2 = inlined_call_operand.hbm [shape: f32[1,128], index: 2, kind: output, shape index: {1}]  }
   0x1   :  { %9 = vsyncpa [#allocation4], 0 }
   0x2   :  { %10 = vsyncpa [#allocation7], 0  ;;  %s405_s9 = smov [#allocation2]  }
   0x3   :  { %s16_s10 = sshll.u32 %s405_s9, 4  ;;  %s17_s10 = int_to_ptr.vmem [resolvable:$true] %s16_s10 }
   0x4   :  { %s347_s11 = scalar_lea.vmem %s17_s10, 8192  ;;  %p352_p1 = scmp.lt.s32.totalorder %s17_s10, %s17_s10 }
   0x5   :  { %p348_p0 = scmp.ne.s32.totalorder %s17_s10, %s347_s11  ;;  %p353_p2 = scmp.lt.s32.totalorder %s347_s11, %s347_s11 }
   0x7   :  { %p354_p3 = por %p353_p2, %p352_p1 }
   0x9   :  { %p355_p4 = pnand %p354_p3, %p348_p0 }
   0xb   :  { %358 = shalt.err (!%p355_p4)
}
   0xc   :  { %s406_s12 = smov 128   ;;  %s407_s13 = smov 8  }
   0xd   :  { %22 = dma.hbm_to_vmem [thread:$0]  %s435_s0, 8192, %s17_s10, [#allocation3], %s406_s12, %s406_s12, %s407_s13  }
   0xe   :  { %399 = dma.done.wait [#allocation3], 8192  }
   0xf   :  { %400 = vsyncadd [#allocation3], 4294959104  ;;  %v408_v0 = vmov 0.0   ;;  %v32_v1 = vld [vmem:[#allocation2] sm:$0xff]  ;;  %v33_v2 = vld [vmem:[#allocation2 + $0x8] sm:$0xff]  ;;  %s409_s0 = smov [#allocation5]  }
  0x10   :  { %30 = vst [vmem:[#allocation5] sm:$0x1] %v408_v0  ;;  %31 = vst [vmem:[#allocation6] sm:$0x1] %v408_v0  ;;  %v34_v3 = vld [vmem:[#allocation2 + $0x10] sm:$0xff]  ;;  %v35_v4 = vld [vmem:[#allocation2 + $0x18] sm:$0xff]  ;;  %v97_v5 = vadd.f32 %v33_v2, %v32_v1  ;;  %v169_v6 = vmul.f32 %v32_v1, %v32_v1  ;;  %v170_v7 = vmul.f32 %v33_v2, %v33_v2 }
  0x11   :  { %v171_v8 = vmul.f32 %v34_v3, %v34_v3  ;;  %v36_v9 = vld [vmem:[#allocation2 + $0x20] sm:$0xff]  ;;  %v172_v11 = vmul.f32 %v35_v4, %v35_v4  ;;  %v37_v13 = vld [vmem:[#allocation2 + $0x28] sm:$0xff]  ;;  %v38_v17 = vld [vmem:[#allocation2 + $0x30] sm:$0xff]  ;;  %s310_s16 = sshll.u32 %s409_s0, 4  ;;  %s410_s17 = smov [#allocation6]   ;;  %s311_s16 = int_to_ptr.vmem [resolvable:$true] %s310_s16 }
  0x12   :  { %v98_v10 = vadd.f32 %v97_v5, %v34_v3  ;;  %v233_v12 = vadd.f32 %v170_v7, %v169_v6  ;;  %v173_v15 = vmul.f32 %v36_v9, %v36_v9  ;;  %v174_v19 = vmul.f32 %v37_v13, %v37_v13  ;;  %v39_v21 = vld [vmem:[#allocation2 + $0x38] sm:$0xff]  ;;  %v40_v25 = vld [vmem:[#allocation2 + $0x40] sm:$0xff]  ;;  %v41_v29 = vld [vmem:[#allocation2 + $0x48] sm:$0xff]  ;;  %s320_s18 = sshll.u32 %s410_s17, 4  ;;  %s359_s19 = scalar_lea.vmem %s311_s16, 16  ;;  %s321_s18 = int_to_ptr.vmem [resolvable:$true] %s320_s18 }
  0x13   :  { %v175_v23 = vmul.f32 %v38_v17, %v38_v17  ;;  %v176_v27 = vmul.f32 %v39_v21, %v39_v21  ;;  %v177_v31 = vmul.f32 %v40_v25, %v40_v25  ;;  %v42_v33 = vld [vmem:[#allocation2 + $0x50] sm:$0xff]  ;;  %v178_v35 = vmul.f32 %v41_v29, %v41_v29  ;;  %v43_v37 = vld [vmem:[#allocation2 + $0x58] sm:$0xff]  ;;  %v44_v41 = vld [vmem:[#allocation2 + $0x60] sm:$0xff]  ;;  %p360_p5 = scmp.ne.s32.totalorder %s311_s16, %s359_s19  ;;  %s363_s20 = scalar_lea.vmem %s311_s16, 32 }
  0x14   :  { %v99_v14 = vadd.f32 %v98_v10, %v35_v4  ;;  %v234_v16 = vadd.f32 %v233_v12, %v171_v8  ;;  %v179_v39 = vmul.f32 %v42_v33, %v42_v33  ;;  %v180_v43 = vmul.f32 %v43_v37, %v43_v37  ;;  %v45_v45 = vld [vmem:[#allocation2 + $0x68] sm:$0xff]  ;;  %v46_v49 = vld [vmem:[#allocation2 + $0x70] sm:$0xff]  ;;  %v47_v53 = vld [vmem:[#allocation2 + $0x78] sm:$0xff]  ;;  %p364_p6 = scmp.lt.s32.totalorder %s311_s16, %s311_s16  ;;  %p365_p7 = scmp.lt.s32.totalorder %s363_s20, %s359_s19 }
  0x15   :  { %v181_v47 = vmul.f32 %v44_v41, %v44_v41  ;;  %v182_v51 = vmul.f32 %v45_v45, %v45_v45  ;;  %v183_v55 = vmul.f32 %v46_v49, %v46_v49  ;;  %v48_v57 = vld [vmem:[#allocation2 + $0x80] sm:$0xff]  ;;  %v184_v59 = vmul.f32 %v47_v53, %v47_v53  ;;  %v49_v61 = vld [vmem:[#allocation2 + $0x88] sm:$0xff]  ;;  %v50_v1 = vld [vmem:[#allocation2 + $0x90] sm:$0xff] }
  0x16   :  { %v100_v18 = vadd.f32 %v99_v14, %v36_v9  ;;  %v235_v20 = vadd.f32 %v234_v16, %v172_v11  ;;  %v185_v63 = vmul.f32 %v48_v57, %v48_v57  ;;  %v186_v3 = vmul.f32 %v49_v61, %v49_v61  ;;  %v51_v5 = vld [vmem:[#allocation2 + $0x98] sm:$0xff]  ;;  %v52_v9 = vld [vmem:[#allocation2 + $0xa0] sm:$0xff]  ;;  %p366_p8 = por %p365_p7, %p364_p6 }
  0x17   :  { %v187_v7 = vmul.f32 %v50_v1, %v50_v1  ;;  %v188_v11 = vmul.f32 %v51_v5, %v51_v5 }
  0x18   :  { %v101_v22 = vadd.f32 %v100_v18, %v37_v13  ;;  %v236_v24 = vadd.f32 %v235_v20, %v173_v15  ;;  %v53_v13 = vld [vmem:[#allocation2 + $0xa8] sm:$0xff]  ;;  %v189_v15 = vmul.f32 %v52_v9, %v52_v9  ;;  %p367_p9 = pnand %p366_p8, %p360_p5 }
  0x1a   :  { %v102_v26 = vadd.f32 %v101_v22, %v38_v17  ;;  %v237_v28 = vadd.f32 %v236_v24, %v174_v19  ;;  %v54_v17 = vld [vmem:[#allocation2 + $0xb0] sm:$0xff]  ;;  %v190_v19 = vmul.f32 %v53_v13, %v53_v13 }
  0x1c   :  { %v103_v30 = vadd.f32 %v102_v26, %v39_v21  ;;  %v238_v32 = vadd.f32 %v237_v28, %v175_v23  ;;  %v55_v21 = vld [vmem:[#allocation2 + $0xb8] sm:$0xff]  ;;  %v191_v23 = vmul.f32 %v54_v17, %v54_v17 }
  0x1e   :  { %v104_v34 = vadd.f32 %v103_v30, %v40_v25  ;;  %v239_v36 = vadd.f32 %v238_v32, %v176_v27  ;;  %v56_v25 = vld [vmem:[#allocation2 + $0xc0] sm:$0xff]  ;;  %v192_v27 = vmul.f32 %v55_v21, %v55_v21 }
  0x20   :  { %v105_v38 = vadd.f32 %v104_v34, %v41_v29  ;;  %v240_v40 = vadd.f32 %v239_v36, %v177_v31  ;;  %v57_v29 = vld [vmem:[#allocation2 + $0xc8] sm:$0xff]  ;;  %v193_v31 = vmul.f32 %v56_v25, %v56_v25 }
  0x22   :  { %v106_v42 = vadd.f32 %v105_v38, %v42_v33  ;;  %v241_v44 = vadd.f32 %v240_v40, %v178_v35  ;;  %v58_v33 = vld [vmem:[#allocation2 + $0xd0] sm:$0xff]  ;;  %v194_v35 = vmul.f32 %v57_v29, %v57_v29 }
  0x24   :  { %v107_v46 = vadd.f32 %v106_v42, %v43_v37  ;;  %v242_v48 = vadd.f32 %v241_v44, %v179_v39  ;;  %v59_v37 = vld [vmem:[#allocation2 + $0xd8] sm:$0xff]  ;;  %v195_v39 = vmul.f32 %v58_v33, %v58_v33 }
  0x26   :  { %v108_v50 = vadd.f32 %v107_v46, %v44_v41  ;;  %v243_v52 = vadd.f32 %v242_v48, %v180_v43  ;;  %v60_v41 = vld [vmem:[#allocation2 + $0xe0] sm:$0xff]  ;;  %v196_v43 = vmul.f32 %v59_v37, %v59_v37 }
  0x28   :  { %v109_v54 = vadd.f32 %v108_v50, %v45_v45  ;;  %v244_v56 = vadd.f32 %v243_v52, %v181_v47  ;;  %v61_v45 = vld [vmem:[#allocation2 + $0xe8] sm:$0xff]  ;;  %v197_v47 = vmul.f32 %v60_v41, %v60_v41 }
  0x2a   :  { %v110_v58 = vadd.f32 %v109_v54, %v46_v49  ;;  %v245_v60 = vadd.f32 %v244_v56, %v182_v51  ;;  %v62_v49 = vld [vmem:[#allocation2 + $0xf0] sm:$0xff]  ;;  %v198_v51 = vmul.f32 %v61_v45, %v61_v45 }
  0x2c   :  { %v111_v62 = vadd.f32 %v110_v58, %v47_v53  ;;  %v246_v0 = vadd.f32 %v245_v60, %v183_v55  ;;  %v63_v53 = vld [vmem:[#allocation2 + $0xf8] sm:$0xff]  ;;  %v199_v55 = vmul.f32 %v62_v49, %v62_v49 }
  0x2e   :  { %v112_v2 = vadd.f32 %v111_v62, %v48_v57  ;;  %v247_v4 = vadd.f32 %v246_v0, %v184_v59  ;;  %v64_v57 = vld [vmem:[#allocation2 + $0x100] sm:$0xff]  ;;  %v200_v59 = vmul.f32 %v63_v53, %v63_v53 }
  0x30   :  { %v113_v6 = vadd.f32 %v112_v2, %v49_v61  ;;  %v248_v8 = vadd.f32 %v247_v4, %v185_v63  ;;  %v65_v61 = vld [vmem:[#allocation2 + $0x108] sm:$0xff]  ;;  %v201_v63 = vmul.f32 %v64_v57, %v64_v57 }
  0x32   :  { %v114_v10 = vadd.f32 %v113_v6, %v50_v1  ;;  %v249_v12 = vadd.f32 %v248_v8, %v186_v3  ;;  %v66_v1 = vld [vmem:[#allocation2 + $0x110] sm:$0xff]  ;;  %v202_v3 = vmul.f32 %v65_v61, %v65_v61 }
  0x34   :  { %v115_v14 = vadd.f32 %v114_v10, %v51_v5  ;;  %v250_v16 = vadd.f32 %v249_v12, %v187_v7  ;;  %v67_v5 = vld [vmem:[#allocation2 + $0x118] sm:$0xff]  ;;  %v203_v7 = vmul.f32 %v66_v1, %v66_v1 }
  0x36   :  { %v116_v18 = vadd.f32 %v115_v14, %v52_v9  ;;  %v251_v20 = vadd.f32 %v250_v16, %v188_v11  ;;  %v68_v9 = vld [vmem:[#allocation2 + $0x120] sm:$0xff]  ;;  %v204_v11 = vmul.f32 %v67_v5, %v67_v5 }
  0x38   :  { %v117_v22 = vadd.f32 %v116_v18, %v53_v13  ;;  %v252_v24 = vadd.f32 %v251_v20, %v189_v15  ;;  %v69_v13 = vld [vmem:[#allocation2 + $0x128] sm:$0xff]  ;;  %v205_v15 = vmul.f32 %v68_v9, %v68_v9 }
  0x3a   :  { %v118_v26 = vadd.f32 %v117_v22, %v54_v17  ;;  %v253_v28 = vadd.f32 %v252_v24, %v190_v19  ;;  %v70_v17 = vld [vmem:[#allocation2 + $0x130] sm:$0xff]  ;;  %v206_v19 = vmul.f32 %v69_v13, %v69_v13 }
  0x3c   :  { %v119_v30 = vadd.f32 %v118_v26, %v55_v21  ;;  %v254_v32 = vadd.f32 %v253_v28, %v191_v23  ;;  %v71_v21 = vld [vmem:[#allocation2 + $0x138] sm:$0xff]  ;;  %v207_v23 = vmul.f32 %v70_v17, %v70_v17 }
  0x3e   :  { %v120_v34 = vadd.f32 %v119_v30, %v56_v25  ;;  %v255_v36 = vadd.f32 %v254_v32, %v192_v27  ;;  %v72_v25 = vld [vmem:[#allocation2 + $0x140] sm:$0xff]  ;;  %v208_v27 = vmul.f32 %v71_v21, %v71_v21 }
  0x40   :  { %v121_v38 = vadd.f32 %v120_v34, %v57_v29  ;;  %v256_v40 = vadd.f32 %v255_v36, %v193_v31  ;;  %v73_v29 = vld [vmem:[#allocation2 + $0x148] sm:$0xff]  ;;  %v209_v31 = vmul.f32 %v72_v25, %v72_v25 }
  0x42   :  { %v122_v42 = vadd.f32 %v121_v38, %v58_v33  ;;  %v257_v44 = vadd.f32 %v256_v40, %v194_v35  ;;  %v74_v33 = vld [vmem:[#allocation2 + $0x150] sm:$0xff]  ;;  %v210_v35 = vmul.f32 %v73_v29, %v73_v29 }
  0x44   :  { %v123_v46 = vadd.f32 %v122_v42, %v59_v37  ;;  %v258_v48 = vadd.f32 %v257_v44, %v195_v39  ;;  %v75_v37 = vld [vmem:[#allocation2 + $0x158] sm:$0xff]  ;;  %v211_v39 = vmul.f32 %v74_v33, %v74_v33 }
  0x46   :  { %v124_v50 = vadd.f32 %v123_v46, %v60_v41  ;;  %v259_v52 = vadd.f32 %v258_v48, %v196_v43  ;;  %v76_v41 = vld [vmem:[#allocation2 + $0x160] sm:$0xff]  ;;  %v212_v43 = vmul.f32 %v75_v37, %v75_v37 }
  0x48   :  { %v125_v54 = vadd.f32 %v124_v50, %v61_v45  ;;  %v260_v56 = vadd.f32 %v259_v52, %v197_v47  ;;  %v77_v45 = vld [vmem:[#allocation2 + $0x168] sm:$0xff]  ;;  %v213_v47 = vmul.f32 %v76_v41, %v76_v41 }
  0x4a   :  { %v126_v58 = vadd.f32 %v125_v54, %v62_v49  ;;  %v261_v60 = vadd.f32 %v260_v56, %v198_v51  ;;  %v78_v49 = vld [vmem:[#allocation2 + $0x170] sm:$0xff]  ;;  %v214_v51 = vmul.f32 %v77_v45, %v77_v45 }
  0x4c   :  { %v127_v62 = vadd.f32 %v126_v58, %v63_v53  ;;  %v262_v0 = vadd.f32 %v261_v60, %v199_v55  ;;  %v79_v53 = vld [vmem:[#allocation2 + $0x178] sm:$0xff]  ;;  %v215_v55 = vmul.f32 %v78_v49, %v78_v49 }
  0x4e   :  { %v128_v2 = vadd.f32 %v127_v62, %v64_v57  ;;  %v263_v4 = vadd.f32 %v262_v0, %v200_v59  ;;  %v80_v57 = vld [vmem:[#allocation2 + $0x180] sm:$0xff]  ;;  %v216_v59 = vmul.f32 %v79_v53, %v79_v53 }
  0x50   :  { %v129_v6 = vadd.f32 %v128_v2, %v65_v61  ;;  %v264_v8 = vadd.f32 %v263_v4, %v201_v63  ;;  %v81_v61 = vld [vmem:[#allocation2 + $0x188] sm:$0xff]  ;;  %v217_v63 = vmul.f32 %v80_v57, %v80_v57 }
  0x52   :  { %v130_v10 = vadd.f32 %v129_v6, %v66_v1  ;;  %v265_v12 = vadd.f32 %v264_v8, %v202_v3  ;;  %v82_v1 = vld [vmem:[#allocation2 + $0x190] sm:$0xff]  ;;  %v218_v3 = vmul.f32 %v81_v61, %v81_v61 }
  0x54   :  { %v131_v14 = vadd.f32 %v130_v10, %v67_v5  ;;  %v266_v16 = vadd.f32 %v265_v12, %v203_v7  ;;  %v83_v5 = vld [vmem:[#allocation2 + $0x198] sm:$0xff]  ;;  %v219_v7 = vmul.f32 %v82_v1, %v82_v1 }
  0x56   :  { %v132_v18 = vadd.f32 %v131_v14, %v68_v9  ;;  %v267_v20 = vadd.f32 %v266_v16, %v204_v11  ;;  %v84_v9 = vld [vmem:[#allocation2 + $0x1a0] sm:$0xff]  ;;  %v220_v11 = vmul.f32 %v83_v5, %v83_v5 }
  0x58   :  { %v133_v22 = vadd.f32 %v132_v18, %v69_v13  ;;  %v268_v24 = vadd.f32 %v267_v20, %v205_v15  ;;  %v85_v13 = vld [vmem:[#allocation2 + $0x1a8] sm:$0xff]  ;;  %v221_v15 = vmul.f32 %v84_v9, %v84_v9 }
  0x5a   :  { %v134_v26 = vadd.f32 %v133_v22, %v70_v17  ;;  %v269_v28 = vadd.f32 %v268_v24, %v206_v19  ;;  %v86_v17 = vld [vmem:[#allocation2 + $0x1b0] sm:$0xff]  ;;  %v222_v19 = vmul.f32 %v85_v13, %v85_v13 }
  0x5c   :  { %v135_v30 = vadd.f32 %v134_v26, %v71_v21  ;;  %v270_v32 = vadd.f32 %v269_v28, %v207_v23  ;;  %v87_v21 = vld [vmem:[#allocation2 + $0x1b8] sm:$0xff]  ;;  %v223_v23 = vmul.f32 %v86_v17, %v86_v17 }
  0x5e   :  { %v136_v34 = vadd.f32 %v135_v30, %v72_v25  ;;  %v271_v36 = vadd.f32 %v270_v32, %v208_v27  ;;  %v88_v25 = vld [vmem:[#allocation2 + $0x1c0] sm:$0xff]  ;;  %v224_v27 = vmul.f32 %v87_v21, %v87_v21 }
  0x60   :  { %v137_v38 = vadd.f32 %v136_v34, %v73_v29  ;;  %v272_v40 = vadd.f32 %v271_v36, %v209_v31  ;;  %v89_v29 = vld [vmem:[#allocation2 + $0x1c8] sm:$0xff]  ;;  %v225_v31 = vmul.f32 %v88_v25, %v88_v25 }
  0x62   :  { %v138_v42 = vadd.f32 %v137_v38, %v74_v33  ;;  %v273_v44 = vadd.f32 %v272_v40, %v210_v35  ;;  %v90_v33 = vld [vmem:[#allocation2 + $0x1d0] sm:$0xff]  ;;  %v226_v35 = vmul.f32 %v89_v29, %v89_v29 }
  0x64   :  { %v139_v46 = vadd.f32 %v138_v42, %v75_v37  ;;  %v274_v48 = vadd.f32 %v273_v44, %v211_v39  ;;  %v91_v37 = vld [vmem:[#allocation2 + $0x1d8] sm:$0xff]  ;;  %v227_v39 = vmul.f32 %v90_v33, %v90_v33 }
  0x66   :  { %v140_v50 = vadd.f32 %v139_v46, %v76_v41  ;;  %v275_v52 = vadd.f32 %v274_v48, %v212_v43  ;;  %v92_v41 = vld [vmem:[#allocation2 + $0x1e0] sm:$0xff]  ;;  %v228_v43 = vmul.f32 %v91_v37, %v91_v37 }
  0x68   :  { %v141_v54 = vadd.f32 %v140_v50, %v77_v45  ;;  %v276_v56 = vadd.f32 %v275_v52, %v213_v47  ;;  %v93_v45 = vld [vmem:[#allocation2 + $0x1e8] sm:$0xff]  ;;  %v229_v47 = vmul.f32 %v92_v41, %v92_v41 }
  0x6a   :  { %v142_v58 = vadd.f32 %v141_v54, %v78_v49  ;;  %v277_v60 = vadd.f32 %v276_v56, %v214_v51  ;;  %v94_v49 = vld [vmem:[#allocation2 + $0x1f0] sm:$0xff]  ;;  %v230_v51 = vmul.f32 %v93_v45, %v93_v45 }
  0x6c   :  { %v143_v62 = vadd.f32 %v142_v58, %v79_v53  ;;  %v278_v0 = vadd.f32 %v277_v60, %v215_v55  ;;  %v95_v53 = vld [vmem:[#allocation2 + $0x1f8] sm:$0xff]  ;;  %v231_v55 = vmul.f32 %v94_v49, %v94_v49 }
  0x6d   :  { %v232_v58 = vmul.f32 %v95_v53, %v95_v53 }
  0x6e   :  { %v144_v2 = vadd.f32 %v143_v62, %v80_v57  ;;  %v279_v4 = vadd.f32 %v278_v0, %v216_v59 }
  0x70   :  { %v145_v6 = vadd.f32 %v144_v2, %v81_v61  ;;  %v280_v8 = vadd.f32 %v279_v4, %v217_v63 }
  0x72   :  { %v146_v10 = vadd.f32 %v145_v6, %v82_v1  ;;  %v281_v12 = vadd.f32 %v280_v8, %v218_v3 }
  0x74   :  { %v147_v14 = vadd.f32 %v146_v10, %v83_v5  ;;  %v282_v16 = vadd.f32 %v281_v12, %v219_v7  ;;  %v96_v7 = vld [vmem:[#allocation5] sm:$0x1]  ;;  %v168_v12 = vld [vmem:[#allocation6] sm:$0x1] }
  0x76   :  { %v148_v18 = vadd.f32 %v147_v14, %v84_v9  ;;  %v283_v20 = vadd.f32 %v282_v16, %v220_v11 }
  0x78   :  { %v149_v22 = vadd.f32 %v148_v18, %v85_v13  ;;  %v284_v24 = vadd.f32 %v283_v20, %v221_v15 }
  0x7a   :  { %v150_v26 = vadd.f32 %v149_v22, %v86_v17  ;;  %v285_v28 = vadd.f32 %v284_v24, %v222_v19 }
  0x7c   :  { %v151_v30 = vadd.f32 %v150_v26, %v87_v21  ;;  %v286_v32 = vadd.f32 %v285_v28, %v223_v23 }
  0x7e   :  { %v152_v34 = vadd.f32 %v151_v30, %v88_v25  ;;  %v287_v36 = vadd.f32 %v286_v32, %v224_v27 }
  0x80   :  { %v153_v38 = vadd.f32 %v152_v34, %v89_v29  ;;  %v288_v40 = vadd.f32 %v287_v36, %v225_v31 }
  0x82   :  { %v154_v42 = vadd.f32 %v153_v38, %v90_v33  ;;  %v289_v44 = vadd.f32 %v288_v40, %v226_v35 }
  0x84   :  { %v155_v46 = vadd.f32 %v154_v42, %v91_v37  ;;  %v290_v48 = vadd.f32 %v289_v44, %v227_v39 }
  0x86   :  { %v156_v50 = vadd.f32 %v155_v46, %v92_v41  ;;  %v291_v52 = vadd.f32 %v290_v48, %v228_v43 }
  0x88   :  { %v157_v54 = vadd.f32 %v156_v50, %v93_v45  ;;  %v292_v56 = vadd.f32 %v291_v52, %v229_v47 }
  0x8a   :  { %v158_v57 = vadd.f32 %v157_v54, %v94_v49  ;;  %v293_v59 = vadd.f32 %v292_v56, %v230_v51 }
  0x8c   :  { %v159_v60 = vadd.f32 %v158_v57, %v95_v53  ;;  %v294_v61 = vadd.f32 %v293_v59, %v231_v55 }
  0x8e   :  { %v160_v62 = vrot.slane %v159_v60, 4  ;;  %v295_v63 = vadd.f32 %v294_v61, %v232_v58 }
  0x90   :  { %v161_v0 = vadd.f32 %v160_v62, %v159_v60  ;;  %v296_v1 = vrot.slane %v295_v63, 4 }
  0x92   :  { %v162_v2 = vrot.slane %v161_v0, 2  ;;  %v297_v3 = vadd.f32 %v296_v1, %v295_v63 }
  0x94   :  { %v163_v4 = vadd.f32 %v162_v2, %v161_v0  ;;  %v298_v5 = vrot.slane %v297_v3, 2 }
  0x96   :  { %v164_v6 = vrot.slane %v163_v4, 1  ;;  %v299_v8 = vadd.f32 %v298_v5, %v297_v3 }
  0x98   :  { %v165_v9 = vadd.f32 %v164_v6, %v163_v4  ;;  %v300_v10 = vrot.slane %v299_v8, 1 }
  0x9a   :  { %v166_v11 = vadd.f32 %v165_v9, %v96_v7  ;;  %v301_v13 = vadd.f32 %v300_v10, %v299_v8 }
  0x9c   :  { %167 = vst [vmem:[#allocation5] sm:$0x1] %v166_v11  ;;  %v302_v14 = vadd.f32 %v301_v13, %v168_v12 }
  0x9d   :  { %370 = shalt.err (!%p367_p9)
}
  0x9e   :  { %313 = dma.vmem_to_hbm [thread:$0]  %s311_s16, 16, %s436_s1, [#allocation4]   ;;  %303 = vst [vmem:[#allocation6] sm:$0x1] %v302_v14 }
  0x9f   :  { %s379_s23 = scalar_lea.vmem %s321_s18, 16  ;;  %s383_s24 = scalar_lea.vmem %s321_s18, 32 }
  0xa0   :  { %p380_p10 = scmp.ne.s32.totalorder %s321_s18, %s379_s23  ;;  %p384_p11 = scmp.lt.s32.totalorder %s321_s18, %s321_s18 }
  0xa1   :  { %p385_p12 = scmp.lt.s32.totalorder %s383_s24, %s379_s23 }
  0xa3   :  { %p386_p13 = por %p385_p12, %p384_p11 }
  0xa5   :  { %p387_p0 = pnand %p386_p13, %p380_p10 }
  0xa7   :  { %390 = shalt.err (!%p387_p0)
}
  0xa8   :  { %323 = dma.vmem_to_hbm [thread:$0]  %s321_s18, 16, %s437_s2, [#allocation7]  }
  0xa9   :  { %401 = dma.done.wait [#allocation4], 16  }
  0xaa   :  { %402 = vsyncadd [#allocation4], 4294967280 }
  0xab   :  { %403 = dma.done.wait [#allocation7], 16  }
  0xac   :  { %404 = vsyncadd [#allocation7], 4294967280 }
  0xad   :  { %330 = vsyncpa [#allocation3], 1 }
  0xae   :  { %331 = vsyncpa [#allocation4], 1 }
  0xaf   :  { %332 = vsyncpa [#allocation7], 1 }

</bundles_post_ra>
